<compile_context>
chip_gen: v6e
topology: v6e:2x2x1
jax: 0.10.0
libtpu: 0.0.40
codegen_flags: <defaults>
</compile_context>

<pallas_src>
import numpy as np
import jax
import jax.numpy as jnp
from jax.experimental import pallas as pl
from jax.experimental.pallas import tpu as pltpu


# ----------------------------------------------------------------------------
# Host-side construction of the (static) separable blur operator.
# ----------------------------------------------------------------------------
def _filter_1d_weights(ksize, filter_type, H, W):
    """Separable 1D tap weights (w_h, w_w), matching kornia semantics."""
    if filter_type == "Mean":          # kornia.filters.box_blur (normalized)
        w = np.full((ksize,), 1.0 / ksize, dtype=np.float64)
        return w, w
    if filter_type == "Gaussian":      # kornia.filters.gaussian_blur2d
        # sigma formula copied from the PyTorch module (from W and H resp.).
        sigma_x = 0.3 * ((W - 1) * 0.5 - 1) + 0.8
        sigma_y = 0.3 * ((H - 1) * 0.5 - 1) + 0.8

        def g1d(n, sigma):
            ax = np.arange(n, dtype=np.float64) - (n - 1) / 2.0
            k = np.exp(-(ax * ax) / (2.0 * sigma * sigma))
            return k / k.sum()

        return g1d(ksize, sigma_y), g1d(ksize, sigma_x)
    # TODO(synk): filter_type == 'Median' (kornia.filters.median_blur) needs a
    # per-window sort; not implemented as a Pallas kernel here.
    raise NotImplementedError(filter_type)


def _blur_matrix_1d(n, w1d):
    """(n, n) matrix applying a reflect-padded 1D convolution with taps w1d."""
    k = len(w1d)
    pad = k // 2
    B = np.zeros((n, n), dtype=np.float64)
    for i in range(n):
        for d in range(k):
            j = i - pad + d
            if j < 0:                  # 'reflect' (no edge repeat), matches
                j = -j                 # jnp.pad/torch/kornia reflect.
            elif j >= n:
                j = 2 * (n - 1) - j
            B[i, j] += w1d[d]
    return B


# ----------------------------------------------------------------------------
# Pallas kernel: one (Rp, HW) tile, two MXU matmuls + residual add.
# ----------------------------------------------------------------------------
def _kernel(x_ref, st_ref, w_ref, b_ref, o_ref):
    x = x_ref[...]                                            # (Rp, HW) f32
    # Reflect-padded separable blur as a lane-dense MXU matmul.
    blur = jnp.dot(x, st_ref[...], preferred_element_type=jnp.float32)
    # 1x1 conv batched over images via block-diagonal weights + bias.
    conv = jnp.dot(w_ref[...], blur, preferred_element_type=jnp.float32) + b_ref[...]
    # Residual: new_x = x + conv(blur(x)).
    o_ref[...] = x + conv


def filter_denoising_block_forward(x, conv_w, conv_b, *, ksize, filter_type):
    """x: (N, C, H, W) f32; conv_w: (C, C, 1, 1); conv_b: (C,)."""
    N, C, H, W = x.shape
    HW = H * W

    # Static spatial blur operator S^T (reflect padding folded in).
    w_h, w_w = _filter_1d_weights(ksize, filter_type, H, W)
    S_T = np.kron(_blur_matrix_1d(H, w_h), _blur_matrix_1d(W, w_w)).T
    S_T = jnp.asarray(S_T, jnp.float32)                        # (HW, HW)

    # Flatten (N, C) onto the sublane axis; pad rows to a full 8-sublane vreg.
    R = N * C
    Rp = ((R + 7) // 8) * 8
    x_flat = x.astype(jnp.float32).reshape(R, HW)
    if Rp != R:
        x_flat = jnp.pad(x_flat, ((0, Rp - R), (0, 0)))

    # Block-diagonal 1x1-conv weights (channel mix per image) + repeated bias.
    w2d = conv_w.reshape(C, C).astype(jnp.float32)
    w_big = jnp.kron(jnp.eye(N, dtype=jnp.float32), w2d)       # (R, R)
    w_big = jnp.pad(w_big, ((0, Rp - R), (0, Rp - R)))
    b_big = jnp.tile(conv_b.reshape(C, 1).astype(jnp.float32), (N, 1))
    b_big = jnp.pad(b_big, ((0, Rp - R), (0, 0)))

    cost = pl.CostEstimate(
        flops=2 * Rp * HW * HW + 2 * Rp * Rp * HW + 2 * Rp * HW,
        transcendentals=0,
        bytes_accessed=4 * (2 * Rp * HW + HW * HW + Rp * Rp + Rp),
    )

    out_flat = pl.pallas_call(
        _kernel,
        out_shape=jax.ShapeDtypeStruct((Rp, HW), jnp.float32),
        grid_spec=pltpu.PrefetchScalarGridSpec(
            num_scalar_prefetch=0,
            grid=(1,),                                          # single step
            in_specs=[
                pl.BlockSpec((Rp, HW), lambda i: (0, 0)),       # activations
                pl.BlockSpec((HW, HW), lambda i: (0, 0)),       # S^T blur matrix
                pl.BlockSpec((Rp, Rp), lambda i: (0, 0)),       # block-diag 1x1 W
                pl.BlockSpec((Rp, 1), lambda i: (0, 0)),        # bias
            ],
            out_specs=pl.BlockSpec((Rp, HW), lambda i: (0, 0)),
        ),
        compiler_params=pltpu.CompilerParams(
            dimension_semantics=("arbitrary",)),
        cost_estimate=cost,
    )(x_flat, S_T, w_big, b_big)

    return out_flat[:R].reshape(N, C, H, W)


# ----------------------------------------------------------------------------
# Pure-JAX reference mirroring the PyTorch module (tap-by-tap, padded input).
# ----------------------------------------------------------------------------
def _reference_forward(x, conv_w, conv_b, *, ksize, filter_type):
    N, C, H, W = x.shape
    pad = ksize // 2
    w_h, w_w = _filter_1d_weights(ksize, filter_type, H, W)
    fker = jnp.asarray(np.outer(w_h, w_w), jnp.float32)
    xp = jnp.pad(x, ((0, 0), (0, 0), (pad, pad), (pad, pad)), mode="reflect")
    blur = jnp.zeros_like(x)
    for di in range(ksize):
        for dj in range(ksize):
            blur = blur + fker[di, dj] * xp[:, :, di:di + H, dj:dj + W]
    w2d = conv_w.reshape(C, C)
    conv = jnp.einsum("oc,nchw->nohw", w2d, blur) + conv_b[None, :, None, None]
    return x + conv


if __name__ == "__main__":
    key = jax.random.PRNGKey(0)
    kx, kw, kb = jax.random.split(key, 3)

    N, C, H, W = 2, 4, 16, 16        # small CIFAR-like shapes
    ksize = 3

    x = jax.random.normal(kx, (N, C, H, W), jnp.float32)
    # nn.Conv2d(C, C, 1) default init: U(-b, b), b = 1/sqrt(fan_in), fan_in = C.
    bound = 1.0 / np.sqrt(C)
    conv_w = jax.random.uniform(kw, (C, C, 1, 1), jnp.float32, -bound, bound)
    conv_b = jax.random.uniform(kb, (C,), jnp.float32, -bound, bound)

    for filter_type in ("Mean", "Gaussian"):
        out = filter_denoising_block_forward(
            x, conv_w, conv_b, ksize=ksize, filter_type=filter_type)
        out = jax.block_until_ready(out)
        ref = _reference_forward(
            x, conv_w, conv_b, ksize=ksize, filter_type=filter_type)
        np.testing.assert_allclose(
            np.asarray(out), np.asarray(ref), rtol=1e-5, atol=1e-5)

    print("KERNEL_OK")
</pallas_src>

<mosaic_0001>
module attributes {stable_mosaic.version = 11 : i64} {
  func.func @_kernel(%arg0: i32, %arg1: memref<8x256xf32, #tpu.memory_space<vmem>>, %arg2: memref<256x256xf32, #tpu.memory_space<vmem>>, %arg3: memref<8x8xf32, #tpu.memory_space<vmem>>, %arg4: memref<8x1xf32, #tpu.memory_space<vmem>>, %arg5: memref<8x256xf32, #tpu.memory_space<vmem>>) attributes {dimension_semantics = [#tpu.dimension_semantics<arbitrary>], iteration_bounds = array<i64: 1>, scalar_prefetch = 0 : i64, scratch_operands = 0 : i64, tpu.core_type = #tpu.core_type<tc>, window_params = [{pipeline_mode = #tpu.pipeline_mode<synchronous>, transform_indices = @transform_0, window_bounds = array<i64: 8, 256>}, {pipeline_mode = #tpu.pipeline_mode<synchronous>, transform_indices = @transform_1, window_bounds = array<i64: 256, 256>}, {pipeline_mode = #tpu.pipeline_mode<synchronous>, transform_indices = @transform_2, window_bounds = array<i64: 8, 8>}, {pipeline_mode = #tpu.pipeline_mode<synchronous>, transform_indices = @transform_3, window_bounds = array<i64: 8, 1>}, {pipeline_mode = #tpu.pipeline_mode<synchronous>, transform_indices = @transform_4, window_bounds = array<i64: 8, 256>}]} {
    %c0 = arith.constant 0 : index
    %c0_0 = arith.constant 0 : index
    %0 = vector.load %arg1[%c0, %c0_0] : memref<8x256xf32, #tpu.memory_space<vmem>>, vector<8x256xf32>
    %c0_1 = arith.constant 0 : index
    %c0_2 = arith.constant 0 : index
    %1 = vector.load %arg2[%c0_1, %c0_2] : memref<256x256xf32, #tpu.memory_space<vmem>>, vector<256x256xf32>
    %cst = arith.constant dense<0.000000e+00> : vector<8x256xf32>
    %2 = tpu.matmul %0, %1, %cst {dimension_numbers = #tpu.dot_dimension_numbers<[1], [0], [0], [1], [0, 0, 1, 1], [], []>} : vector<8x256xf32>, vector<256x256xf32>, vector<8x256xf32> -> vector<8x256xf32>
    %c0_3 = arith.constant 0 : index
    %c0_4 = arith.constant 0 : index
    %3 = vector.load %arg3[%c0_3, %c0_4] : memref<8x8xf32, #tpu.memory_space<vmem>>, vector<8x8xf32>
    %cst_5 = arith.constant dense<0.000000e+00> : vector<8x256xf32>
    %4 = tpu.matmul %3, %2, %cst_5 {dimension_numbers = #tpu.dot_dimension_numbers<[1], [0], [0], [1], [0, 0, 1, 1], [], []>} : vector<8x8xf32>, vector<8x256xf32>, vector<8x256xf32> -> vector<8x256xf32>
    %c0_6 = arith.constant 0 : index
    %c0_7 = arith.constant 0 : index
    %5 = vector.load %arg4[%c0_6, %c0_7] : memref<8x1xf32, #tpu.memory_space<vmem>>, vector<8x1xf32>
    %6 = vector.broadcast %5 : vector<8x1xf32> to vector<8x256xf32>
    %7 = arith.addf %4, %6 : vector<8x256xf32>
    %8 = arith.addf %0, %7 : vector<8x256xf32>
    %c0_8 = arith.constant 0 : index
    %c0_9 = arith.constant 0 : index
    %9 = vector.load %arg5[%c0_8, %c0_9] : memref<8x256xf32, #tpu.memory_space<vmem>>, vector<8x256xf32>
    tpu.vector_store %arg5[%c0_8, %c0_9], %8 {strides = array<i32>} : memref<8x256xf32, #tpu.memory_space<vmem>>, vector<8x256xf32>,
    return
  }
  func.func @transform_0(%arg0: i32) -> (i32, i32) {
    %c0_i32 = arith.constant 0 : i32
    %c0_i32_0 = arith.constant 0 : i32
    %c0_i32_1 = arith.constant 0 : i32
    return %c0_i32, %c0_i32_0 : i32, i32
  }
  func.func @transform_1(%arg0: i32) -> (i32, i32) {
    %c0_i32 = arith.constant 0 : i32
    %c0_i32_0 = arith.constant 0 : i32
    %c0_i32_1 = arith.constant 0 : i32
    return %c0_i32, %c0_i32_0 : i32, i32
  }
  func.func @transform_2(%arg0: i32) -> (i32, i32) {
    %c0_i32 = arith.constant 0 : i32
    %c0_i32_0 = arith.constant 0 : i32
    %c0_i32_1 = arith.constant 0 : i32
    return %c0_i32, %c0_i32_0 : i32, i32
  }
  func.func @transform_3(%arg0: i32) -> (i32, i32) {
    %c0_i32 = arith.constant 0 : i32
    %c0_i32_0 = arith.constant 0 : i32
    %c0_i32_1 = arith.constant 0 : i32
    return %c0_i32, %c0_i32_0 : i32, i32
  }
  func.func @transform_4(%arg0: i32) -> (i32, i32) {
    %c0_i32 = arith.constant 0 : i32
    %c0_i32_0 = arith.constant 0 : i32
    %c0_i32_1 = arith.constant 0 : i32
    return %c0_i32, %c0_i32_0 : i32, i32
  }
}

</mosaic_0001>

<bundles_post_ra>
// kernel: tpu_custom_call.1
= control target key start
LH: loop header
LB: loop body
LE: loop exit
PB: predicated region body
PF: predicated region fallthrough
CT: control target
= control target key end

     0   :  { %9 = vsyncpa [#allocation3], 0  ;;  %s409_s0 = inlined_call_operand.hbm [shape: f32[8,256], index: 0, kind: input, shape index: {}]   ;;  %s410_s1 = inlined_call_operand.hbm [shape: f32[256,256], index: 1, kind: input, shape index: {}]   ;;  %s411_s2 = inlined_call_operand.vmem [shape: f32[8,8], index: 2, kind: input, shape index: {}]   ;;  %s412_s3 = inlined_call_operand.vmem [shape: f32[8,1], index: 3, kind: input, shape index: {}]   ;;  %s413_s4 = inlined_call_operand.hbm [shape: f32[8,256], index: 4, kind: output, shape index: {}]  }
   0x1   :  { %10 = vsyncpa [#allocation6], 0 }
   0x2   :  { %11 = vsyncpa [#allocation4], 0  ;;  %s358_s15 = smov [#allocation2]   ;;  %s359_s17 = smov [#allocation5]  }
   0x3   :  { %s18_s16 = sshll.u32 %s358_s15, 4  ;;  %s27_s18 = sshll.u32 %s359_s17, 4  ;;  %s19_s16 = int_to_ptr.vmem [resolvable:$true] %s18_s16  ;;  %s28_s18 = int_to_ptr.vmem [resolvable:$true] %s27_s18 }
   0x4   :  { %s300_s19 = scalar_lea.vmem %s19_s16, 256  ;;  %p305_p1 = scmp.lt.s32.totalorder %s19_s16, %s19_s16 }
   0x5   :  { %p301_p0 = scmp.ne.s32.totalorder %s19_s16, %s300_s19  ;;  %p306_p2 = scmp.lt.s32.totalorder %s300_s19, %s300_s19 }
   0x7   :  { %p307_p3 = por %p306_p2, %p305_p1 }
   0x9   :  { %p308_p4 = pnand %p307_p3, %p301_p0 }
   0xb   :  { %311 = shalt.err (!%p308_p4)
}
   0xc   :  { %21 = dma.hbm_to_vmem [thread:$0]  %s409_s0, 256, %s19_s16, [#allocation3]  }
   0xd   :  { %s320_s22 = scalar_lea.vmem %s28_s18, 8192  ;;  %p325_p6 = scmp.lt.s32.totalorder %s28_s18, %s28_s18 }
   0xe   :  { %p321_p5 = scmp.ne.s32.totalorder %s28_s18, %s320_s22  ;;  %p326_p7 = scmp.lt.s32.totalorder %s320_s22, %s320_s22 }
  0x10   :  { %p327_p8 = por %p326_p7, %p325_p6 }
  0x12   :  { %p328_p9 = pnand %p327_p8, %p321_p5 }
  0x14   :  { %331 = shalt.err (!%p328_p9)
}
  0x15   :  { %s360_s23 = smov 256   ;;  %s361_s24 = smov 16  }
  0x16   :  { %33 = dma.hbm_to_vmem [thread:$0]  %s410_s1, 8192, %s28_s18, [#allocation6], %s360_s23, %s360_s23, %s361_s24  }
  0x17   :  { %352 = dma.done.wait [#allocation3], 256  }
  0x18   :  { %353 = vsyncadd [#allocation3], 4294967040 }
  0x19   :  { %354 = dma.done.wait [#allocation6], 8192  }
  0x1a   :  { %355 = vsyncadd [#allocation6], 4294959104  ;;  %v77_v0 = vld [vmem:[#allocation5 + $0xf8] sm:$0xff]  ;;  %v76_v1 = vld [vmem:[#allocation5 + $0xf0] sm:$0xff]  ;;  %vm188_vm0 = vcmask 64512   ;;  %s364_s29 = smov [#allocation7]  }
  0x1b   :  { %v75_v2 = vld [vmem:[#allocation5 + $0xe8] sm:$0xff]  ;;  %110 = vmatprep.subr.mxu0 %v77_v0  ;;  %v74_v3 = vld [vmem:[#allocation5 + $0xe0] sm:$0xff]  ;;  %v73_v4 = vld [vmem:[#allocation5 + $0xd8] sm:$0xff]  ;;  %s273_s30 = sshll.u32 %s364_s29, 4  ;;  %s274_s30 = int_to_ptr.vmem [resolvable:$true] %s273_s30 }
  0x1c   :  { %111 = vmatpush1.msra.mxu0 %v76_v1  ;;  %v72_v5 = vld [vmem:[#allocation5 + $0xd0] sm:$0xff]  ;;  %v71_v6 = vld [vmem:[#allocation5 + $0xc8] sm:$0xff]  ;;  %v70_v7 = vld [vmem:[#allocation5 + $0xc0] sm:$0xff]  ;;  %p337_p11 = scmp.lt.s32.totalorder %s274_s30, %s274_s30 }
  0x1d   :  { %112 = vmatprep.subr.mxu0 %v75_v2  ;;  %v69_v8 = vld [vmem:[#allocation5 + $0xb8] sm:$0xff]  ;;  %v68_v9 = vld [vmem:[#allocation5 + $0xb0] sm:$0xff]  ;;  %v67_v10 = vld [vmem:[#allocation5 + $0xa8] sm:$0xff]  ;;  %v362_v2 = vmov 0.0  }
  0x1e   :  { %113 = vmatpush1.msra.mxu0 %v74_v3  ;;  %v66_v11 = vld [vmem:[#allocation5 + $0xa0] sm:$0xff]  ;;  %v65_v12 = vld [vmem:[#allocation5 + $0x98] sm:$0xff]  ;;  %v64_v13 = vld [vmem:[#allocation5 + $0x90] sm:$0xff]  ;;  %256 = vmatprep.mubr.f32.mxu1 %v362_v2 }
  0x1f   :  { %114 = vmatprep.subr.mxu0 %v73_v4  ;;  %v63_v14 = vld [vmem:[#allocation5 + $0x88] sm:$0xff]  ;;  %v62_v15 = vld [vmem:[#allocation5 + $0x80] sm:$0xff]  ;;  %v61_v16 = vld [vmem:[#allocation5 + $0x78] sm:$0xff]  ;;  %v363_v4 = vmov 0  }
  0x20   :  { %115 = vmatpush1.msra.mxu0 %v72_v5  ;;  %v60_v17 = vld [vmem:[#allocation5 + $0x70] sm:$0xff]  ;;  %v59_v18 = vld [vmem:[#allocation5 + $0x68] sm:$0xff]  ;;  %v58_v19 = vld [vmem:[#allocation5 + $0x60] sm:$0xff]  ;;  %291 = vset.pattern.permute.xlu0 %v363_v4 }
  0x21   :  { %116 = vmatprep.subr.mxu0 %v71_v6  ;;  %v57_v20 = vld [vmem:[#allocation5 + $0x58] sm:$0xff]  ;;  %v56_v21 = vld [vmem:[#allocation5 + $0x50] sm:$0xff]  ;;  %v55_v22 = vld [vmem:[#allocation5 + $0x48] sm:$0xff] }
  0x22   :  { %117 = vmatpush1.msra.mxu0 %v70_v7  ;;  %v54_v23 = vld [vmem:[#allocation5 + $0x40] sm:$0xff]  ;;  %v396_v24 = vld [vmem:[#allocation2 + $0x8] sm:$0xff]  ;;  %v52_v26 = vld [vmem:[#allocation5 + $0x30] sm:$0xff] }
  0x23   :  { %118 = vmatprep.subr.mxu0 %v69_v8  ;;  %v53_v25 = vld [vmem:[#allocation5 + $0x38] sm:$0xff]  ;;  %174 = vmatprep.mubr.f32.mxu0 %v396_v24  ;;  %v51_v27 = vld [vmem:[#allocation5 + $0x28] sm:$0xff]  ;;  %v50_v28 = vld [vmem:[#allocation5 + $0x20] sm:$0xff] }
  0x24   :  { %119 = vmatpush1.msra.mxu0 %v68_v9  ;;  %v49_v29 = vld [vmem:[#allocation5 + $0x18] sm:$0xff]  ;;  %v48_v30 = vld [vmem:[#allocation5 + $0x10] sm:$0xff]  ;;  %v47_v31 = vld [vmem:[#allocation5 + $0x8] sm:$0xff] }
  0x25   :  { %120 = vmatprep.subr.mxu0 %v67_v10  ;;  %v46_v32 = vld [vmem:[#allocation5] sm:$0xff]  ;;  %v109_v33 = vld [vmem:[#allocation5 + $0x1f8] sm:$0xff]  ;;  %v108_v34 = vld [vmem:[#allocation5 + $0x1f0] sm:$0xff] }
  0x26   :  { %121 = vmatpush1.msra.mxu0 %v66_v11  ;;  %v107_v35 = vld [vmem:[#allocation5 + $0x1e8] sm:$0xff]  ;;  %v106_v36 = vld [vmem:[#allocation5 + $0x1e0] sm:$0xff]  ;;  %v105_v37 = vld [vmem:[#allocation5 + $0x1d8] sm:$0xff] }
  0x27   :  { %122 = vmatprep.subr.mxu0 %v65_v12  ;;  %v104_v38 = vld [vmem:[#allocation5 + $0x1d0] sm:$0xff]  ;;  %v103_v39 = vld [vmem:[#allocation5 + $0x1c8] sm:$0xff]  ;;  %v102_v40 = vld [vmem:[#allocation5 + $0x1c0] sm:$0xff] }
  0x28   :  { %123 = vmatpush1.msra.mxu0 %v64_v13  ;;  %v101_v41 = vld [vmem:[#allocation5 + $0x1b8] sm:$0xff]  ;;  %v100_v42 = vld [vmem:[#allocation5 + $0x1b0] sm:$0xff]  ;;  %v99_v43 = vld [vmem:[#allocation5 + $0x1a8] sm:$0xff] }
  0x29   :  { %124 = vmatprep.subr.mxu0 %v63_v14  ;;  %v98_v44 = vld [vmem:[#allocation5 + $0x1a0] sm:$0xff]  ;;  %v97_v45 = vld [vmem:[#allocation5 + $0x198] sm:$0xff]  ;;  %v96_v46 = vld [vmem:[#allocation5 + $0x190] sm:$0xff] }
  0x2a   :  { %125 = vmatpush1.msra.mxu0 %v62_v15  ;;  %v95_v47 = vld [vmem:[#allocation5 + $0x188] sm:$0xff]  ;;  %v94_v48 = vld [vmem:[#allocation5 + $0x180] sm:$0xff]  ;;  %v93_v49 = vld [vmem:[#allocation5 + $0x178] sm:$0xff] }
  0x2b   :  { %126 = vmatprep.subr.mxu0 %v61_v16  ;;  %v92_v50 = vld [vmem:[#allocation5 + $0x170] sm:$0xff]  ;;  %v91_v51 = vld [vmem:[#allocation5 + $0x168] sm:$0xff]  ;;  %v90_v52 = vld [vmem:[#allocation5 + $0x160] sm:$0xff] }
  0x2c   :  { %127 = vmatpush1.msra.mxu0 %v60_v17  ;;  %v89_v53 = vld [vmem:[#allocation5 + $0x158] sm:$0xff]  ;;  %v88_v54 = vld [vmem:[#allocation5 + $0x150] sm:$0xff]  ;;  %v87_v55 = vld [vmem:[#allocation5 + $0x148] sm:$0xff] }
  0x2d   :  { %128 = vmatprep.subr.mxu0 %v59_v18  ;;  %v86_v56 = vld [vmem:[#allocation5 + $0x140] sm:$0xff]  ;;  %v85_v57 = vld [vmem:[#allocation5 + $0x138] sm:$0xff]  ;;  %v84_v58 = vld [vmem:[#allocation5 + $0x130] sm:$0xff] }
  0x2e   :  { %129 = vmatpush1.msra.mxu0 %v58_v19  ;;  %v83_v59 = vld [vmem:[#allocation5 + $0x128] sm:$0xff]  ;;  %v82_v60 = vld [vmem:[#allocation5 + $0x120] sm:$0xff]  ;;  %v81_v61 = vld [vmem:[#allocation5 + $0x118] sm:$0xff] }
  0x2f   :  { %130 = vmatprep.subr.mxu0 %v57_v20  ;;  %v80_v62 = vld [vmem:[#allocation5 + $0x110] sm:$0xff]  ;;  %v79_v63 = vld [vmem:[#allocation5 + $0x108] sm:$0xff]  ;;  %v78_v0 = vld [vmem:[#allocation5 + $0x100] sm:$0xff] }
  0x30   :  { %131 = vmatpush1.msra.mxu0 %v56_v21  ;;  %v44_v1 = vld [vmem:[#allocation2] sm:$0xff] }
  0x31   :  { %132 = vmatprep.subr.mxu0 %v55_v22  ;;  %v182_v3 = vld [vmem:[%s412_s3] sm:$0xff]  ;;  %s332_s3 = scalar_lea.vmem %s274_s30, 256 }
  0x32   :  { %133 = vmatpush1.msra.mxu0 %v54_v23  ;;  %185 = vperm.xlu0 %291, %v182_v3   ;;  %v181_v7 = vld [vmem:[%s411_s2] sm:$0xff]  ;;  %p333_p10 = scmp.ne.s32.totalorder %s274_s30, %s332_s3  ;;  %p338_p12 = scmp.lt.s32.totalorder %s332_s3, %s332_s3 }
  0x33   :  { %134 = vmatprep.subr.mxu0 %v53_v25 }
  0x34   :  { %135 = vmatpush1.msra.mxu0 %v52_v26  ;;  %p339_p13 = por %p338_p12, %p337_p11 }
  0x35   :  { %136 = vmatprep.subr.mxu0 %v51_v27 }
  0x36   :  { %137 = vmatpush1.msra.mxu0 %v50_v28  ;;  %p340_p0 = pnand %p339_p13, %p333_p10 }
  0x37   :  { %138 = vmatprep.subr.mxu0 %v49_v29 }
  0x38   :  { %139 = vmatpush1.msra.mxu0 %v48_v30 }
  0x39   :  { %140 = vmatprep.subr.mxu0 %v47_v31 }
  0x3a   :  { %141 = vmatpush1.msra.mxu0 %v46_v32 }
  0x3b   :  { %142 = vmatprep.subr.mxu0 %v109_v33 }
  0x3c   :  { %143 = vmatpush2.msra.mxu0 %v108_v34 }
  0x3d   :  { %144 = vmatprep.subr.mxu0 %v107_v35 }
  0x3e   :  { %145 = vmatpush2.msra.mxu0 %v106_v36 }
  0x3f   :  { %146 = vmatprep.subr.mxu0 %v105_v37 }
  0x40   :  { %147 = vmatpush2.msra.mxu0 %v104_v38 }
  0x41   :  { %148 = vmatprep.subr.mxu0 %v103_v39 }
  0x42   :  { %149 = vmatpush2.msra.mxu0 %v102_v40 }
  0x43   :  { %150 = vmatprep.subr.mxu0 %v101_v41 }
  0x44   :  { %151 = vmatpush2.msra.mxu0 %v100_v42 }
  0x45   :  { %152 = vmatprep.subr.mxu0 %v99_v43 }
  0x46   :  { %153 = vmatpush2.msra.mxu0 %v98_v44 }
  0x47   :  { %154 = vmatprep.subr.mxu0 %v97_v45 }
  0x48   :  { %155 = vmatpush2.msra.mxu0 %v96_v46 }
  0x49   :  { %156 = vmatprep.subr.mxu0 %v95_v47 }
  0x4a   :  { %157 = vmatpush2.msra.mxu0 %v94_v48 }
  0x4b   :  { %158 = vmatprep.subr.mxu0 %v93_v49 }
  0x4c   :  { %159 = vmatpush2.msra.mxu0 %v92_v50 }
  0x4d   :  { %160 = vmatprep.subr.mxu0 %v91_v51 }
  0x4e   :  { %161 = vmatpush2.msra.mxu0 %v90_v52 }
  0x4f   :  { %162 = vmatprep.subr.mxu0 %v89_v53 }
  0x50   :  { %163 = vmatpush2.msra.mxu0 %v88_v54 }
  0x51   :  { %164 = vmatprep.subr.mxu0 %v87_v55 }
  0x52   :  { %165 = vmatpush2.msra.mxu0 %v86_v56 }
  0x53   :  { %166 = vmatprep.subr.mxu0 %v85_v57 }
  0x54   :  { %167 = vmatpush2.msra.mxu0 %v84_v58 }
  0x55   :  { %168 = vmatprep.subr.mxu0 %v83_v59 }
  0x56   :  { %169 = vmatpush2.msra.mxu0 %v82_v60 }
  0x57   :  { %170 = vmatprep.subr.mxu0 %v81_v61 }
  0x58   :  { %171 = vmatpush2.msra.mxu0 %v80_v62 }
  0x59   :  { %172 = vmatprep.subr.mxu0 %v79_v63 }
  0x5a   :  { %173 = vmatpush2.msra.mxu0 %v78_v0 }
  0x5b   :  { %175 = vmatmul.mubr.f32.vlgmr.msra.gmra.mxu0 %v44_v1 }
  0xad   :  { %v186_v8 = vpop.permute.xlu0 %185 }
 0x11b   :  { %v176_v5 = vpop.f32.mrf.mxu0 }
 0x11d   :  { %v178_v6 = vpop.f32.mrf.mxu0 }
 0x11e   :  { %222 = vmatprep.subr.mxu1 %v178_v6 }
 0x11f   :  { %223 = vmatpush1.msra.mxu1 %v176_v5 }
 0x120   :  { %283 = vmatmul.mubr.msk.f32.vlgmr.msra.gmra.mxu1 %vm188_vm0, %v181_v7 }
 0x1e0   :  { %v258_v9 = vpop.f32.mrf.mxu1 }
 0x1e1   :  { %v259_v10 = vadd.f32 %v258_v9, %v186_v8 }
 0x1e2   :  { %v260_v11 = vpop.f32.mrf.mxu1 }
 0x1e3   :  { %v263_v12 = vadd.f32 %v259_v10, %v44_v1  ;;  %v261_v13 = vadd.f32 %v260_v11, %v186_v8 }
 0x1e5   :  { %265 = vst [vmem:[#allocation7] sm:$0xff] %v263_v12  ;;  %v264_v14 = vadd.f32 %v261_v13, %v396_v24 }
 0x1e7   :  { %266 = vst [vmem:[#allocation7 + $0x8] sm:$0xff] %v264_v14 }
 0x1e8   :  { %343 = shalt.err (!%p340_p0)
}
 0x1e9   :  { %276 = dma.vmem_to_hbm [thread:$0]  %s274_s30, 256, %s413_s4, [#allocation4]  }
 0x1ea   :  { %356 = dma.done.wait [#allocation4], 256  }
 0x1eb   :  { %357 = vsyncadd [#allocation4], 4294967040 }
 0x1ec   :  { %280 = vsyncpa [#allocation3], 1 }
 0x1ed   :  { %281 = vsyncpa [#allocation6], 1 }
 0x1ee   :  { %282 = vsyncpa [#allocation4], 1 }

</bundles_post_ra>
